<compile_context>
chip_gen: v7x
topology: tpu7x:2x2x1
jax: 0.10.0
libtpu: 0.0.40
codegen_flags: <defaults>
</compile_context>

<pallas_src>
import jax
import jax.numpy as jnp
from jax.experimental import pallas as pl
from jax.experimental.pallas import tpu as pltpu

FEATURES_IN = 28 * 28      # 784, as produced by nn.Flatten on (N, 1, 28, 28)
FEATURES_PAD = 896         # 7 * 128, lane-aligned K for the first matmul
HIDDEN1 = 512
HIDDEN2 = 128
OUT_DIM = 10
OUT_PAD = 128              # lane-dense output slab; sliced to 10 outside


def _round_up(x, m):
    return (x + m - 1) // m * m


def mlp_kernel(x_ref, w1_ref, b1_ref, w2_ref, b2_ref, w3_ref, b3_ref, out_ref):
    # Layer 1: (tile_n, 896) @ (896, 512) + b1, ReLU   (bf16 in, f32 acc)
    h1 = jnp.dot(x_ref[...], w1_ref[...], preferred_element_type=jnp.float32)
    h1 = jnp.maximum(h1 + b1_ref[...], 0.0).astype(jnp.bfloat16)
    # Layer 2: (tile_n, 512) @ (512, 128) + b2, ReLU
    h2 = jnp.dot(h1, w2_ref[...], preferred_element_type=jnp.float32)
    h2 = jnp.maximum(h2 + b2_ref[...], 0.0).astype(jnp.bfloat16)
    # Layer 3: (tile_n, 128) @ (128, 128-padded) + b3 -> padded logits (f32)
    logits = jnp.dot(h2, w3_ref[...], preferred_element_type=jnp.float32)
    out_ref[...] = logits + b3_ref[...]


def mlp_forward(x_nchw, params, tile_n=512):
    w1, b1, w2, b2, w3, b3 = params
    n = x_nchw.shape[0]

    # Flatten exactly like nn.Flatten on NCHW input (row-major).
    x = x_nchw.reshape(n, -1)

    # Batch tile: multiple of 8 (f32/bf16 sublane); shrink for tiny batches so
    # the N=2 test path doesn't pad to 512 rows.
    tile_n = min(tile_n, max(8, _round_up(n, 8)))
    n_pad = _round_up(n, tile_n)

    # Zero-pad batch rows and feature columns; cast MXU operands to bf16.
    x_p = jnp.zeros((n_pad, FEATURES_PAD), jnp.bfloat16)
    x_p = x_p.at[:n, :FEATURES_IN].set(x.astype(jnp.bfloat16))

    w1_p = jnp.zeros((FEATURES_PAD, HIDDEN1), jnp.bfloat16)
    w1_p = w1_p.at[:FEATURES_IN, :].set(w1.astype(jnp.bfloat16))
    w2_b = w2.astype(jnp.bfloat16)
    w3_p = jnp.zeros((HIDDEN2, OUT_PAD), jnp.bfloat16)
    w3_p = w3_p.at[:, :OUT_DIM].set(w3.astype(jnp.bfloat16))

    b1_f = b1.astype(jnp.float32)
    b2_f = b2.astype(jnp.float32)
    b3_p = jnp.zeros((1, OUT_PAD), jnp.float32)
    b3_p = b3_p.at[:, :OUT_DIM].set(b3.astype(jnp.float32))

    grid = (n_pad // tile_n,)
    # Weights/biases use constant index_maps -> fetched once, VMEM-resident.
    const = lambda arr: pl.BlockSpec(arr.shape, lambda i: (0,) * arr.ndim)

    out_padded = pl.pallas_call(
        mlp_kernel,
        out_shape=jax.ShapeDtypeStruct((n_pad, OUT_PAD), jnp.float32),
        grid=grid,
        in_specs=[
            pl.BlockSpec((tile_n, FEATURES_PAD), lambda i: (i, 0)),
            const(w1_p), const(b1_f),
            const(w2_b), const(b2_f),
            const(w3_p), const(b3_p),
        ],
        out_specs=pl.BlockSpec((tile_n, OUT_PAD), lambda i: (i, 0)),
        compiler_params=pltpu.CompilerParams(
            dimension_semantics=("parallel",)),
    )(x_p, w1_p, b1_f, w2_b, b2_f, w3_p, b3_p)

    return out_padded[:n, :OUT_DIM]


def mlp_reference(x_nchw, params):
    # Plain-JAX reference following the same bf16-operand / f32-accumulate
    # math path as the kernel.
    w1, b1, w2, b2, w3, b3 = params
    n = x_nchw.shape[0]
    x = x_nchw.reshape(n, -1).astype(jnp.bfloat16)
    h1 = jnp.dot(x, w1.astype(jnp.bfloat16),
                 preferred_element_type=jnp.float32) + b1
    h1 = jnp.maximum(h1, 0.0).astype(jnp.bfloat16)
    h2 = jnp.dot(h1, w2.astype(jnp.bfloat16),
                 preferred_element_type=jnp.float32) + b2
    h2 = jnp.maximum(h2, 0.0).astype(jnp.bfloat16)
    return jnp.dot(h2, w3.astype(jnp.bfloat16),
                   preferred_element_type=jnp.float32) + b3


def init_params(key):
    # Deterministic init mimicking PyTorch's default U(-1/sqrt(fan_in), +1/sqrt(fan_in)).
    def linear(key, fan_in, fan_out):
        kw, kb = jax.random.split(key)
        bound = 1.0 / jnp.sqrt(fan_in)
        w = jax.random.uniform(kw, (fan_in, fan_out), jnp.float32, -bound, bound)
        b = jax.random.uniform(kb, (1, fan_out), jnp.float32, -bound, bound)
        return w, b

    k1, k2, k3 = jax.random.split(key, 3)
    w1, b1 = linear(k1, FEATURES_IN, HIDDEN1)
    w2, b2 = linear(k2, HIDDEN1, HIDDEN2)
    w3, b3 = linear(k3, HIDDEN2, OUT_DIM)
    return (w1, b1, w2, b2, w3, b3)


if __name__ == "__main__":
    key = jax.random.PRNGKey(0)
    k_params, k_x = jax.random.split(key)
    params = init_params(k_params)

    # Small MNIST-like batch: (N=2, C=1, H=28, W=28), NCHW like PyTorch.
    x = jax.random.normal(k_x, (2, 1, 28, 28), jnp.float32)

    logits = mlp_forward(x, params)
    jax.block_until_ready(logits)

    ref = mlp_reference(x, params)
    assert logits.shape == (2, OUT_DIM)
    assert jnp.allclose(logits, ref, atol=1e-2, rtol=1e-2), (
        f"max abs err {jnp.max(jnp.abs(logits - ref))}")

    print("KERNEL_OK")
</pallas_src>

<mosaic_0001>
module attributes {stable_mosaic.version = 11 : i64} {
  func.func @mlp_kernel(%arg0: i32, %arg1: memref<8x896xbf16, #tpu.memory_space<vmem>>, %arg2: memref<896x512xbf16, #tpu.memory_space<vmem>>, %arg3: memref<1x512xf32, #tpu.memory_space<vmem>>, %arg4: memref<512x128xbf16, #tpu.memory_space<vmem>>, %arg5: memref<1x128xf32, #tpu.memory_space<vmem>>, %arg6: memref<128x128xbf16, #tpu.memory_space<vmem>>, %arg7: memref<1x128xf32, #tpu.memory_space<vmem>>, %arg8: memref<8x128xf32, #tpu.memory_space<vmem>>) attributes {dimension_semantics = [#tpu.dimension_semantics<parallel>], iteration_bounds = array<i64: 1>, scalar_prefetch = 0 : i64, scratch_operands = 0 : i64, tpu.core_type = #tpu.core_type<tc>, window_params = [{transform_indices = @transform_0, window_bounds = array<i64: 8, 896>}, {pipeline_mode = #tpu.pipeline_mode<synchronous>, transform_indices = @transform_1, window_bounds = array<i64: 896, 512>}, {pipeline_mode = #tpu.pipeline_mode<synchronous>, transform_indices = @transform_2, window_bounds = array<i64: 1, 512>}, {pipeline_mode = #tpu.pipeline_mode<synchronous>, transform_indices = @transform_3, window_bounds = array<i64: 512, 128>}, {pipeline_mode = #tpu.pipeline_mode<synchronous>, transform_indices = @transform_4, window_bounds = array<i64: 1, 128>}, {pipeline_mode = #tpu.pipeline_mode<synchronous>, transform_indices = @transform_5, window_bounds = array<i64: 128, 128>}, {pipeline_mode = #tpu.pipeline_mode<synchronous>, transform_indices = @transform_6, window_bounds = array<i64: 1, 128>}, {transform_indices = @transform_7, window_bounds = array<i64: 8, 128>}]} {
    %c0 = arith.constant 0 : index
    %c0_0 = arith.constant 0 : index
    %0 = vector.load %arg1[%c0, %c0_0] : memref<8x896xbf16, #tpu.memory_space<vmem>>, vector<8x896xbf16>
    %c0_1 = arith.constant 0 : index
    %c0_2 = arith.constant 0 : index
    %1 = vector.load %arg2[%c0_1, %c0_2] : memref<896x512xbf16, #tpu.memory_space<vmem>>, vector<896x512xbf16>
    %cst = arith.constant dense<0.000000e+00> : vector<8x512xf32>
    %2 = tpu.matmul %0, %1, %cst {dimension_numbers = #tpu.dot_dimension_numbers<[1], [0], [0], [1], [0, 0, 1, 1], [], []>} : vector<8x896xbf16>, vector<896x512xbf16>, vector<8x512xf32> -> vector<8x512xf32>
    %c0_3 = arith.constant 0 : index
    %c0_4 = arith.constant 0 : index
    %3 = vector.load %arg3[%c0_3, %c0_4] : memref<1x512xf32, #tpu.memory_space<vmem>>, vector<1x512xf32>
    %4 = vector.broadcast %3 : vector<1x512xf32> to vector<8x512xf32>
    %5 = arith.addf %2, %4 : vector<8x512xf32>
    %cst_5 = arith.constant 0.000000e+00 : f32
    %6 = vector.broadcast %cst_5 : f32 to vector<8x512xf32>
    %7 = arith.maximumf %5, %6 : vector<8x512xf32>
    %8 = arith.truncf %7 : vector<8x512xf32> to vector<8x512xbf16>
    %c0_6 = arith.constant 0 : index
    %c0_7 = arith.constant 0 : index
    %9 = vector.load %arg4[%c0_6, %c0_7] : memref<512x128xbf16, #tpu.memory_space<vmem>>, vector<512x128xbf16>
    %cst_8 = arith.constant dense<0.000000e+00> : vector<8x128xf32>
    %10 = tpu.matmul %8, %9, %cst_8 {dimension_numbers = #tpu.dot_dimension_numbers<[1], [0], [0], [1], [0, 0, 1, 1], [], []>} : vector<8x512xbf16>, vector<512x128xbf16>, vector<8x128xf32> -> vector<8x128xf32>
    %c0_9 = arith.constant 0 : index
    %c0_10 = arith.constant 0 : index
    %11 = vector.load %arg5[%c0_9, %c0_10] : memref<1x128xf32, #tpu.memory_space<vmem>>, vector<1x128xf32>
    %12 = vector.broadcast %11 : vector<1x128xf32> to vector<8x128xf32>
    %13 = arith.addf %10, %12 : vector<8x128xf32>
    %cst_11 = arith.constant 0.000000e+00 : f32
    %14 = vector.broadcast %cst_11 : f32 to vector<8x128xf32>
    %15 = arith.maximumf %13, %14 : vector<8x128xf32>
    %16 = arith.truncf %15 : vector<8x128xf32> to vector<8x128xbf16>
    %c0_12 = arith.constant 0 : index
    %c0_13 = arith.constant 0 : index
    %17 = vector.load %arg6[%c0_12, %c0_13] : memref<128x128xbf16, #tpu.memory_space<vmem>>, vector<128x128xbf16>
    %cst_14 = arith.constant dense<0.000000e+00> : vector<8x128xf32>
    %18 = tpu.matmul %16, %17, %cst_14 {dimension_numbers = #tpu.dot_dimension_numbers<[1], [0], [0], [1], [0, 0, 1, 1], [], []>} : vector<8x128xbf16>, vector<128x128xbf16>, vector<8x128xf32> -> vector<8x128xf32>
    %c0_15 = arith.constant 0 : index
    %c0_16 = arith.constant 0 : index
    %19 = vector.load %arg7[%c0_15, %c0_16] : memref<1x128xf32, #tpu.memory_space<vmem>>, vector<1x128xf32>
    %20 = vector.broadcast %19 : vector<1x128xf32> to vector<8x128xf32>
    %21 = arith.addf %18, %20 : vector<8x128xf32>
    %c0_17 = arith.constant 0 : index
    %c0_18 = arith.constant 0 : index
    %22 = vector.load %arg8[%c0_17, %c0_18] : memref<8x128xf32, #tpu.memory_space<vmem>>, vector<8x128xf32>
    tpu.vector_store %arg8[%c0_17, %c0_18], %21 {strides = array<i32>} : memref<8x128xf32, #tpu.memory_space<vmem>>, vector<8x128xf32>,
    return
  }
  func.func @transform_0(%arg0: i32) -> (i32, i32) {
    %c0_i32 = arith.constant 0 : i32
    %c0_i32_0 = arith.constant 0 : i32
    return %arg0, %c0_i32 : i32, i32
  }
  func.func @transform_1(%arg0: i32) -> (i32, i32) {
    %c0_i32 = arith.constant 0 : i32
    %c0_i32_0 = arith.constant 0 : i32
    %c0_i32_1 = arith.constant 0 : i32
    return %c0_i32, %c0_i32_0 : i32, i32
  }
  func.func @transform_2(%arg0: i32) -> (i32, i32) {
    %c0_i32 = arith.constant 0 : i32
    %c0_i32_0 = arith.constant 0 : i32
    %c0_i32_1 = arith.constant 0 : i32
    return %c0_i32, %c0_i32_0 : i32, i32
  }
  func.func @transform_3(%arg0: i32) -> (i32, i32) {
    %c0_i32 = arith.constant 0 : i32
    %c0_i32_0 = arith.constant 0 : i32
    %c0_i32_1 = arith.constant 0 : i32
    return %c0_i32, %c0_i32_0 : i32, i32
  }
  func.func @transform_4(%arg0: i32) -> (i32, i32) {
    %c0_i32 = arith.constant 0 : i32
    %c0_i32_0 = arith.constant 0 : i32
    %c0_i32_1 = arith.constant 0 : i32
    return %c0_i32, %c0_i32_0 : i32, i32
  }
  func.func @transform_5(%arg0: i32) -> (i32, i32) {
    %c0_i32 = arith.constant 0 : i32
    %c0_i32_0 = arith.constant 0 : i32
    %c0_i32_1 = arith.constant 0 : i32
    return %c0_i32, %c0_i32_0 : i32, i32
  }
  func.func @transform_6(%arg0: i32) -> (i32, i32) {
    %c0_i32 = arith.constant 0 : i32
    %c0_i32_0 = arith.constant 0 : i32
    %c0_i32_1 = arith.constant 0 : i32
    return %c0_i32, %c0_i32_0 : i32, i32
  }
  func.func @transform_7(%arg0: i32) -> (i32, i32) {
    %c0_i32 = arith.constant 0 : i32
    %c0_i32_0 = arith.constant 0 : i32
    return %arg0, %c0_i32 : i32, i32
  }
}

</mosaic_0001>

<bundles_post_ra>
// kernel: tpu_custom_call.1
= control target key start
LH: loop header
LB: loop body
LE: loop exit
PB: predicated region body
PF: predicated region fallthrough
CT: control target
= control target key end

     0   :  { %12 = vsyncpa [#allocation3], 0  ;;  %s3306_s0 = inlined_call_operand.hbm [shape: bf16[8,896], index: 0, kind: input, shape index: {}]   ;;  %s3307_s1 = inlined_call_operand.hbm [shape: bf16[896,512], index: 1, kind: input, shape index: {}]   ;;  %s3308_s2 = inlined_call_operand.vmem [shape: f32[1,512], index: 2, kind: input, shape index: {}]   ;;  %s3309_s3 = inlined_call_operand.hbm [shape: bf16[512,128], index: 3, kind: input, shape index: {}]   ;;  %s3310_s4 = inlined_call_operand.vmem [shape: f32[1,128], index: 4, kind: input, shape index: {}]   ;;  %s3311_s5 = inlined_call_operand.hbm [shape: bf16[128,128], index: 5, kind: input, shape index: {}]   ;;  %s3312_s6 = inlined_call_operand.vmem [shape: f32[1,128], index: 6, kind: input, shape index: {}]   ;;  %s3313_s7 = inlined_call_operand.hbm [shape: f32[8,128], index: 7, kind: output, shape index: {}]  }
   0x1   :  { %13 = vsyncpa [#allocation6], 0 }
   0x2   :  { %14 = vsyncpa [#allocation9], 0 }
   0x3   :  { %15 = vsyncpa [#allocation4], 0  ;;  %s3173_s24 = smov [#allocation5]   ;;  %s3055_s28 = scalar_lea.hbm %s3307_s1, 28672 }
   0x4   :  { %s31_s25 = sshll.u32 %s3173_s24, 4  ;;  %p3056_p0 = scmp.ne.s32.totalorder %s3307_s1, %s3055_s28  ;;  %s32_s25 = int_to_ptr.vmem [resolvable:$true] %s31_s25 }
   0x5   :  { %p3059_p1 = scmp.lt.u32.totalorder %s3055_s28, %s3307_s1 }
   0x7   :  { %p3061_p2 = pnand %p3059_p1, %p3056_p0 }
   0x9   :  { %3064 = shalt.err (!%p3061_p2)
}
   0xa   :  { %s3065_s10 = scalar_lea.vmem %s32_s25, 28672  ;;  %p3070_p4 = scmp.lt.s32.totalorder %s32_s25, %s32_s25 }
   0xb   :  { %p3066_p3 = scmp.ne.s32.totalorder %s32_s25, %s3065_s10  ;;  %p3071_p5 = scmp.lt.s32.totalorder %s3065_s10, %s3065_s10 }
   0xd   :  { %p3072_p6 = por %p3071_p5, %p3070_p4 }
   0xf   :  { %p3073_p7 = pnand %p3072_p6, %p3066_p3 }
  0x11   :  { %3076 = shalt.err (!%p3073_p7)
}
  0x12   :  { %s3174_s11 = smov 256   ;;  %s3175_s12 = smov 16  }
  0x13   :  { %37 = dma.hbm_to_vmem [thread:$0]  %s3307_s1, 28672, %s32_s25, [#allocation6], %s3174_s11, %s3174_s11, %s3175_s12  }
  0x14   :  { %s3176_s15 = smov [#allocation2]   ;;  %s3177_s17 = smov [#allocation7]  }
  0x15   :  { %s22_s16 = sshll.u32 %s3176_s15, 4  ;;  %s45_s18 = sshll.u32 %s3177_s17, 4  ;;  %s23_s16 = int_to_ptr.vmem [resolvable:$true] %s22_s16  ;;  %s46_s18 = int_to_ptr.vmem [resolvable:$true] %s45_s18 }
  0x16   :  { %s3077_s21 = scalar_lea.hbm %s3306_s0, 448 }
  0x17   :  { %p3078_p8 = scmp.ne.s32.totalorder %s3306_s0, %s3077_s21  ;;  %p3081_p9 = scmp.lt.u32.totalorder %s3077_s21, %s3306_s0 }
  0x19   :  { %p3083_p10 = pnand %p3081_p9, %p3078_p8 }
  0x1b   :  { %3086 = shalt.err (!%p3083_p10)
}
  0x1c   :  { %s3087_s1 = scalar_lea.vmem %s23_s16, 448  ;;  %p3092_p12 = scmp.lt.s32.totalorder %s23_s16, %s23_s16 }
  0x1d   :  { %p3088_p11 = scmp.ne.s32.totalorder %s23_s16, %s3087_s1  ;;  %p3093_p13 = scmp.lt.s32.totalorder %s3087_s1, %s3087_s1 }
  0x1f   :  { %p3094_p0 = por %p3093_p13, %p3092_p12 }
  0x21   :  { %p3095_p1 = pnand %p3094_p0, %p3088_p11 }
  0x23   :  { %3098 = shalt.err (!%p3095_p1)
}
  0x24   :  { %25 = dma.hbm_to_vmem [thread:$0]  %s3306_s0, 448, %s23_s16, [#allocation3]  }
  0x25   :  { %s3099_s30 = scalar_lea.hbm %s3309_s3, 4096 }
  0x26   :  { %p3100_p2 = scmp.ne.s32.totalorder %s3309_s3, %s3099_s30  ;;  %p3103_p3 = scmp.lt.u32.totalorder %s3099_s30, %s3309_s3 }
  0x28   :  { %p3105_p4 = pnand %p3103_p3, %p3100_p2 }
  0x2a   :  { %3108 = shalt.err (!%p3105_p4)
}
  0x2b   :  { %s3109_s12 = scalar_lea.vmem %s46_s18, 4096  ;;  %p3114_p6 = scmp.lt.s32.totalorder %s46_s18, %s46_s18 }
  0x2c   :  { %p3110_p5 = scmp.ne.s32.totalorder %s46_s18, %s3109_s12  ;;  %p3115_p7 = scmp.lt.s32.totalorder %s3109_s12, %s3109_s12 }
  0x2e   :  { %p3116_p8 = por %p3115_p7, %p3114_p6 }
  0x30   :  { %p3117_p9 = pnand %p3116_p8, %p3110_p5 }
  0x32   :  { %3120 = shalt.err (!%p3117_p9)
}
  0x33   :  { %s3178_s0 = smov 64   ;;  %s3179_s13 = smov 4  }
  0x34   :  { %51 = dma.hbm_to_vmem [thread:$0]  %s3309_s3, 4096, %s46_s18, [#allocation6], %s3178_s0, %s3178_s0, %s3179_s13  }
  0x35   :  { %s3180_s16 = smov [#allocation8]   ;;  %s3121_s21 = scalar_lea.hbm %s3311_s5, 1024 }
  0x36   :  { %s59_s17 = sshll.u32 %s3180_s16, 4  ;;  %p3122_p10 = scmp.ne.s32.totalorder %s3311_s5, %s3121_s21  ;;  %s60_s17 = int_to_ptr.vmem [resolvable:$true] %s59_s17 }
  0x37   :  { %p3125_p11 = scmp.lt.u32.totalorder %s3121_s21, %s3311_s5 }
  0x39   :  { %p3127_p12 = pnand %p3125_p11, %p3122_p10 }
  0x3b   :  { %3130 = shalt.err (!%p3127_p12)
}
  0x3c   :  { %s3131_s1 = scalar_lea.vmem %s60_s17, 1024  ;;  %p3136_p0 = scmp.lt.s32.totalorder %s60_s17, %s60_s17 }
  0x3d   :  { %p3132_p13 = scmp.ne.s32.totalorder %s60_s17, %s3131_s1  ;;  %p3137_p1 = scmp.lt.s32.totalorder %s3131_s1, %s3131_s1 }
  0x3f   :  { %p3138_p2 = por %p3137_p1, %p3136_p0 }
  0x41   :  { %p3139_p3 = pnand %p3138_p2, %p3132_p13 }
  0x43   :  { %3142 = shalt.err (!%p3139_p3)
}
  0x44   :  { %65 = dma.hbm_to_vmem [thread:$0]  %s3311_s5, 1024, %s60_s17, [#allocation9], %s3178_s0, %s3178_s0, %s3179_s13  }
  0x45   :  { %3165 = dma.done.wait [#allocation3], 448  }
  0x46   :  { %3166 = vsyncadd [#allocation3], 4294966848 }
  0x47   :  { %3167 = dma.done.wait [#allocation6], 32768  }
  0x48   :  { %3168 = vsyncadd [#allocation6], 4294934528 }
  0x49   :  { %3169 = dma.done.wait [#allocation9], 1024  }
  0x4a   :  { %3170 = vsyncadd [#allocation9], 4294966272  ;;  %v2672_v0 = vld [vmem:[#allocation5 + $0x4] ss:$16 sps:$4 sm:$0xff]   ;;  %v2674_v1 = vld [vmem:[#allocation5 + $0xc] ss:$16 sps:$4 sm:$0xff]  }
  0x4b   :  { %1476 = vmatprep.subr.bf16.mxu0 %v2672_v0  ;;  %v2676_v2 = vld [vmem:[#allocation5] ss:$16 sps:$4 sm:$0xff]   ;;  %v2677_v3 = vld [vmem:[#allocation5 + $0x8] ss:$16 sps:$4 sm:$0xff]   ;;  %1640 = vmatprep.subr.bf16.mxu1 %v2674_v1  ;;  %v2678_v4 = vld [vmem:[#allocation5 + $0x24] ss:$16 sps:$4 sm:$0xff]  }
  0x4c   :  { %1477 = vmatpush1.bf16.msra.mxu0 %v2676_v2  ;;  %1641 = vmatpush1.bf16.msra.mxu1 %v2677_v3  ;;  %v2680_v5 = vld [vmem:[#allocation5 + $0x2c] ss:$16 sps:$4 sm:$0xff]   ;;  %v2682_v6 = vld [vmem:[#allocation5 + $0x20] ss:$16 sps:$4 sm:$0xff]   ;;  %v2683_v7 = vld [vmem:[#allocation5 + $0x28] ss:$16 sps:$4 sm:$0xff]  }
  0x4d   :  { %1478 = vmatprep.subr.bf16.mxu0 %v2678_v4  ;;  %1642 = vmatprep.subr.bf16.mxu1 %v2680_v5  ;;  %v2684_v8 = vld [vmem:[#allocation5 + $0x44] ss:$16 sps:$4 sm:$0xff]   ;;  %v2686_v9 = vld [vmem:[#allocation5 + $0x4c] ss:$16 sps:$4 sm:$0xff]   ;;  %v2688_v10 = vld [vmem:[#allocation5 + $0x40] ss:$16 sps:$4 sm:$0xff]  }
  0x4e   :  { %v2689_v11 = vld [vmem:[#allocation5 + $0x48] ss:$16 sps:$4 sm:$0xff]   ;;  %v2690_v12 = vld [vmem:[#allocation5 + $0x64] ss:$16 sps:$4 sm:$0xff]   ;;  %v2692_v13 = vld [vmem:[#allocation5 + $0x6c] ss:$16 sps:$4 sm:$0xff]  }
  0x4f   :  { %v2694_v14 = vld [vmem:[#allocation5 + $0x60] ss:$16 sps:$4 sm:$0xff]   ;;  %v2695_v15 = vld [vmem:[#allocation5 + $0x68] ss:$16 sps:$4 sm:$0xff]   ;;  %v2696_v16 = vld [vmem:[#allocation5 + $0x84] ss:$16 sps:$4 sm:$0xff]  }
  0x50   :  { %1479 = vmatpush1.bf16.msra.mxu0 %v2682_v6  ;;  %1643 = vmatpush1.bf16.msra.mxu1 %v2683_v7  ;;  %v2698_v17 = vld [vmem:[#allocation5 + $0x8c] ss:$16 sps:$4 sm:$0xff]   ;;  %v2700_v18 = vld [vmem:[#allocation5 + $0x80] ss:$16 sps:$4 sm:$0xff]   ;;  %v2701_v19 = vld [vmem:[#allocation5 + $0x88] ss:$16 sps:$4 sm:$0xff]  }
  0x51   :  { %1480 = vmatprep.subr.bf16.mxu0 %v2684_v8  ;;  %1644 = vmatprep.subr.bf16.mxu1 %v2686_v9  ;;  %v2702_v20 = vld [vmem:[#allocation5 + $0xa4] ss:$16 sps:$4 sm:$0xff]   ;;  %v2704_v21 = vld [vmem:[#allocation5 + $0xac] ss:$16 sps:$4 sm:$0xff]   ;;  %v2706_v22 = vld [vmem:[#allocation5 + $0xa0] ss:$16 sps:$4 sm:$0xff]  }
  0x52   :  { %v2707_v23 = vld [vmem:[#allocation5 + $0xa8] ss:$16 sps:$4 sm:$0xff]   ;;  %v2708_v24 = vld [vmem:[#allocation5 + $0xc4] ss:$16 sps:$4 sm:$0xff]   ;;  %v2710_v25 = vld [vmem:[#allocation5 + $0xcc] ss:$16 sps:$4 sm:$0xff]  }
  0x53   :  { %v2712_v26 = vld [vmem:[#allocation5 + $0xc0] ss:$16 sps:$4 sm:$0xff]   ;;  %v2713_v27 = vld [vmem:[#allocation5 + $0xc8] ss:$16 sps:$4 sm:$0xff]   ;;  %v2714_v28 = vld [vmem:[#allocation5 + $0xe4] ss:$16 sps:$4 sm:$0xff]  }
  0x54   :  { %1481 = vmatpush1.bf16.msra.mxu0 %v2688_v10  ;;  %1645 = vmatpush1.bf16.msra.mxu1 %v2689_v11  ;;  %v2716_v29 = vld [vmem:[#allocation5 + $0xec] ss:$16 sps:$4 sm:$0xff]   ;;  %v2718_v30 = vld [vmem:[#allocation5 + $0xe0] ss:$16 sps:$4 sm:$0xff]   ;;  %v2719_v31 = vld [vmem:[#allocation5 + $0xe8] ss:$16 sps:$4 sm:$0xff]  }
  0x55   :  { %1482 = vmatprep.subr.bf16.mxu0 %v2690_v12  ;;  %1646 = vmatprep.subr.bf16.mxu1 %v2692_v13  ;;  %v2720_v32 = vld [vmem:[#allocation5 + $0x104] ss:$16 sps:$4 sm:$0xff]   ;;  %v2722_v33 = vld [vmem:[#allocation5 + $0x10c] ss:$16 sps:$4 sm:$0xff]   ;;  %v2724_v34 = vld [vmem:[#allocation5 + $0x100] ss:$16 sps:$4 sm:$0xff]  }
  0x56   :  { %v2725_v35 = vld [vmem:[#allocation5 + $0x108] ss:$16 sps:$4 sm:$0xff]   ;;  %v2726_v36 = vld [vmem:[#allocation5 + $0x124] ss:$16 sps:$4 sm:$0xff]   ;;  %v2728_v37 = vld [vmem:[#allocation5 + $0x12c] ss:$16 sps:$4 sm:$0xff]  }
  0x57   :  { %v2730_v38 = vld [vmem:[#allocation5 + $0x120] ss:$16 sps:$4 sm:$0xff]   ;;  %v2731_v39 = vld [vmem:[#allocation5 + $0x128] ss:$16 sps:$4 sm:$0xff]   ;;  %v2732_v40 = vld [vmem:[#allocation5 + $0x144] ss:$16 sps:$4 sm:$0xff]  }
  0x58   :  { %1483 = vmatpush1.bf16.msra.mxu0 %v2694_v14  ;;  %1647 = vmatpush1.bf16.msra.mxu1 %v2695_v15  ;;  %v2734_v41 = vld [vmem:[#allocation5 + $0x14c] ss:$16 sps:$4 sm:$0xff]   ;;  %v2736_v42 = vld [vmem:[#allocation5 + $0x140] ss:$16 sps:$4 sm:$0xff]   ;;  %v2737_v43 = vld [vmem:[#allocation5 + $0x148] ss:$16 sps:$4 sm:$0xff]  }
  0x59   :  { %1484 = vmatprep.subr.bf16.mxu0 %v2696_v16  ;;  %1648 = vmatprep.subr.bf16.mxu1 %v2698_v17  ;;  %v2738_v44 = vld [vmem:[#allocation5 + $0x164] ss:$16 sps:$4 sm:$0xff]   ;;  %v2740_v45 = vld [vmem:[#allocation5 + $0x16c] ss:$16 sps:$4 sm:$0xff]   ;;  %v2742_v47 = vld [vmem:[#allocation5 + $0x160] ss:$16 sps:$4 sm:$0xff]  }
  0x5a   :  { %v81_v46 = vld [vmem:[#allocation2] sm:$0xff]  ;;  %v2746_v51 = vld [vmem:[#allocation5 + $0x18c] ss:$16 sps:$4 sm:$0xff]   ;;  %v2748_v52 = vld [vmem:[#allocation5 + $0x180] ss:$16 sps:$4 sm:$0xff]   ;;  %vm3183_vm0 = vmmov 0  }
  0x5b   :  { %v2287_v48 = vcombine.high %v81_v46, %v81_v46  ;;  %v2743_v49 = vld [vmem:[#allocation5 + $0x168] ss:$16 sps:$4 sm:$0xff]   ;;  %v2744_v50 = vld [vmem:[#allocation5 + $0x184] ss:$16 sps:$4 sm:$0xff]   ;;  %v2752_v55 = vld [vmem:[#allocation5 + $0x1ac] ss:$16 sps:$4 sm:$0xff]   ;;  %v2286_v4 = vcombine.low %v81_v46, %v81_v46 }
  0x5c   :  { %1485 = vmatpush1.bf16.msra.mxu0 %v2700_v18  ;;  %1649 = vmatpush1.bf16.msra.mxu1 %v2701_v19  ;;  %v2749_v53 = vld [vmem:[#allocation5 + $0x188] ss:$16 sps:$4 sm:$0xff]   ;;  %v2750_v54 = vld [vmem:[#allocation5 + $0x1a4] ss:$16 sps:$4 sm:$0xff]   ;;  %v2754_v56 = vld [vmem:[#allocation5 + $0x1a0] ss:$16 sps:$4 sm:$0xff]  }
  0x5d   :  { %1486 = vmatprep.subr.bf16.mxu0 %v2702_v20  ;;  %1650 = vmatprep.subr.bf16.mxu1 %v2704_v21  ;;  %v2755_v57 = vld [vmem:[#allocation5 + $0x1a8] ss:$16 sps:$4 sm:$0xff]   ;;  %v2756_v58 = vld [vmem:[#allocation5 + $0x1c4] ss:$16 sps:$4 sm:$0xff]   ;;  %v2758_v59 = vld [vmem:[#allocation5 + $0x1cc] ss:$16 sps:$4 sm:$0xff]  }
  0x5e   :  { %1508 = vmatprep.mubr.bf16.mxu0 %v2287_v48  ;;  %1672 = vmatprep.mubr.bf16.mxu1 %v2287_v48  ;;  %v2760_v60 = vld [vmem:[#allocation5 + $0x1c0] ss:$16 sps:$4 sm:$0xff]   ;;  %v2761_v61 = vld [vmem:[#allocation5 + $0x1c8] ss:$16 sps:$4 sm:$0xff]   ;;  %v2762_v62 = vld [vmem:[#allocation5 + $0x1e4] ss:$16 sps:$4 sm:$0xff]  }
  0x5f   :  { %v2764_v63 = vld [vmem:[#allocation5 + $0x1ec] ss:$16 sps:$4 sm:$0xff]   ;;  %v2766_v0 = vld [vmem:[#allocation5 + $0x1e0] ss:$16 sps:$4 sm:$0xff]   ;;  %v2767_v1 = vld [vmem:[#allocation5 + $0x1e8] ss:$16 sps:$4 sm:$0xff]  }
  0x60   :  { %1487 = vmatpush1.bf16.msra.mxu0 %v2706_v22  ;;  %1651 = vmatpush1.bf16.msra.mxu1 %v2707_v23  ;;  %v2772_v2 = vld [vmem:[#allocation5 + $0x204] ss:$16 sps:$4 sm:$0xff]   ;;  %v2775_v3 = vld [vmem:[#allocation5 + $0x20c] ss:$16 sps:$4 sm:$0xff]   ;;  %v2770_v5 = vld [vmem:[#allocation5 + $0x200] ss:$16 sps:$4 sm:$0xff]  }
  0x61   :  { %1488 = vmatprep.subr.bf16.mxu0 %v2708_v24  ;;  %1652 = vmatprep.subr.bf16.mxu1 %v2710_v25  ;;  %v2773_v6 = vld [vmem:[#allocation5 + $0x208] ss:$16 sps:$4 sm:$0xff]   ;;  %v2778_v7 = vld [vmem:[#allocation5 + $0x224] ss:$16 sps:$4 sm:$0xff]   ;;  %v2781_v8 = vld [vmem:[#allocation5 + $0x22c] ss:$16 sps:$4 sm:$0xff]  }
  0x62   :  { %v2776_v9 = vld [vmem:[#allocation5 + $0x220] ss:$16 sps:$4 sm:$0xff]   ;;  %v2779_v10 = vld [vmem:[#allocation5 + $0x228] ss:$16 sps:$4 sm:$0xff]   ;;  %v2784_v11 = vld [vmem:[#allocation5 + $0x244] ss:$16 sps:$4 sm:$0xff]  }
  0x63   :  { %v2787_v12 = vld [vmem:[#allocation5 + $0x24c] ss:$16 sps:$4 sm:$0xff]   ;;  %v2782_v13 = vld [vmem:[#allocation5 + $0x240] ss:$16 sps:$4 sm:$0xff]   ;;  %v2785_v14 = vld [vmem:[#allocation5 + $0x248] ss:$16 sps:$4 sm:$0xff]  }
  0x64   :  { %1489 = vmatpush1.bf16.msra.mxu0 %v2712_v26  ;;  %1653 = vmatpush1.bf16.msra.mxu1 %v2713_v27  ;;  %v2790_v15 = vld [vmem:[#allocation5 + $0x264] ss:$16 sps:$4 sm:$0xff]   ;;  %v2793_v16 = vld [vmem:[#allocation5 + $0x26c] ss:$16 sps:$4 sm:$0xff]   ;;  %v2788_v17 = vld [vmem:[#allocation5 + $0x260] ss:$16 sps:$4 sm:$0xff]  }
  0x65   :  { %1490 = vmatprep.subr.bf16.mxu0 %v2714_v28  ;;  %1654 = vmatprep.subr.bf16.mxu1 %v2716_v29  ;;  %v2791_v18 = vld [vmem:[#allocation5 + $0x268] ss:$16 sps:$4 sm:$0xff]   ;;  %v2796_v19 = vld [vmem:[#allocation5 + $0x284] ss:$16 sps:$4 sm:$0xff]   ;;  %v2799_v20 = vld [vmem:[#allocation5 + $0x28c] ss:$16 sps:$4 sm:$0xff]  }
  0x66   :  { %v2794_v21 = vld [vmem:[#allocation5 + $0x280] ss:$16 sps:$4 sm:$0xff]   ;;  %v2797_v22 = vld [vmem:[#allocation5 + $0x288] ss:$16 sps:$4 sm:$0xff]   ;;  %v2802_v23 = vld [vmem:[#allocation5 + $0x2a4] ss:$16 sps:$4 sm:$0xff]  }
  0x67   :  { %v2805_v24 = vld [vmem:[#allocation5 + $0x2ac] ss:$16 sps:$4 sm:$0xff]   ;;  %v2800_v25 = vld [vmem:[#allocation5 + $0x2a0] ss:$16 sps:$4 sm:$0xff]   ;;  %v2803_v26 = vld [vmem:[#allocation5 + $0x2a8] ss:$16 sps:$4 sm:$0xff]  }
  0x68   :  { %1491 = vmatpush1.bf16.msra.mxu0 %v2718_v30  ;;  %1655 = vmatpush1.bf16.msra.mxu1 %v2719_v31  ;;  %v2808_v27 = vld [vmem:[#allocation5 + $0x2c4] ss:$16 sps:$4 sm:$0xff]   ;;  %v2811_v28 = vld [vmem:[#allocation5 + $0x2cc] ss:$16 sps:$4 sm:$0xff]   ;;  %v2806_v31 = vld [vmem:[#allocation5 + $0x2c0] ss:$16 sps:$4 sm:$0xff]  }
  0x69   :  { %1492 = vmatprep.subr.bf16.mxu0 %v2720_v32  ;;  %1656 = vmatprep.subr.bf16.mxu1 %v2722_v33  ;;  %v3273_v29 = vld [vmem:[#allocation2 + $0x8] sm:$0xff]  ;;  %v2809_v32 = vld [vmem:[#allocation5 + $0x2c8] ss:$16 sps:$4 sm:$0xff]   ;;  %v2814_v33 = vld [vmem:[#allocation5 + $0x2e4] ss:$16 sps:$4 sm:$0xff]   ;;  %s3184_s30 = smov [#allocation10]  }
  0x6a   :  { %v2289_v30 = vcombine.high %v3273_v29, %v3273_v29  ;;  %v2835_v46 = vld [vmem:[#allocation5 + $0x34c] ss:$16 sps:$4 sm:$0xff]   ;;  %v2833_v48 = vld [vmem:[#allocation5 + $0x348] ss:$16 sps:$4 sm:$0xff]   ;;  %s2275_s8 = sshll.u32 %s3184_s30, 4  ;;  %s2276_s8 = int_to_ptr.vmem [resolvable:$true] %s2275_s8 }
  0x6b   :  { %p3148_p5 = scmp.lt.s32.totalorder %s2276_s8, %s2276_s8 }
  0x6c   :  { %1493 = vmatpush1.bf16.msra.mxu0 %v2724_v34  ;;  %1657 = vmatpush1.bf16.msra.mxu1 %v2725_v35  ;;  %v2817_v34 = vld [vmem:[#allocation5 + $0x2ec] ss:$16 sps:$4 sm:$0xff]   ;;  %v2812_v35 = vld [vmem:[#allocation5 + $0x2e0] ss:$16 sps:$4 sm:$0xff]  }
  0x6d   :  { %1494 = vmatprep.subr.bf16.mxu0 %v2726_v36  ;;  %1658 = vmatprep.subr.bf16.mxu1 %v2728_v37  ;;  %v2815_v36 = vld [vmem:[#allocation5 + $0x2e8] ss:$16 sps:$4 sm:$0xff]   ;;  %v2820_v37 = vld [vmem:[#allocation5 + $0x304] ss:$16 sps:$4 sm:$0xff]  }
  0x70   :  { %1495 = vmatpush1.bf16.msra.mxu0 %v2730_v38  ;;  %1659 = vmatpush1.bf16.msra.mxu1 %v2731_v39  ;;  %v2823_v38 = vld [vmem:[#allocation5 + $0x30c] ss:$16 sps:$4 sm:$0xff]   ;;  %v2818_v39 = vld [vmem:[#allocation5 + $0x300] ss:$16 sps:$4 sm:$0xff]  }
  0x71   :  { %1496 = vmatprep.subr.bf16.mxu0 %v2732_v40  ;;  %1660 = vmatprep.subr.bf16.mxu1 %v2734_v41  ;;  %v2821_v40 = vld [vmem:[#allocation5 + $0x308] ss:$16 sps:$4 sm:$0xff]   ;;  %v2826_v41 = vld [vmem:[#allocation5 + $0x324] ss:$16 sps:$4 sm:$0xff]  }
  0x74   :  { %1497 = vmatpush1.bf16.msra.mxu0 %v2736_v42  ;;  %1661 = vmatpush1.bf16.msra.mxu1 %v2737_v43  ;;  %v2829_v42 = vld [vmem:[#allocation5 + $0x32c] ss:$16 sps:$4 sm:$0xff]   ;;  %v2824_v43 = vld [vmem:[#allocation5 + $0x320] ss:$16 sps:$4 sm:$0xff]  }
  0x75   :  { %1498 = vmatprep.subr.bf16.mxu0 %v2738_v44  ;;  %1662 = vmatprep.subr.bf16.mxu1 %v2740_v45  ;;  %v2827_v44 = vld [vmem:[#allocation5 + $0x328] ss:$16 sps:$4 sm:$0xff]   ;;  %v2832_v45 = vld [vmem:[#allocation5 + $0x344] ss:$16 sps:$4 sm:$0xff]  }
  0x78   :  { %1499 = vmatpush1.bf16.msra.mxu0 %v2742_v47  ;;  %1663 = vmatpush1.bf16.msra.mxu1 %v2743_v49  ;;  %v2830_v47 = vld [vmem:[#allocation5 + $0x340] ss:$16 sps:$4 sm:$0xff]   ;;  %v2838_v49 = vld [vmem:[#allocation5 + $0x364] ss:$16 sps:$4 sm:$0xff]  }
  0x79   :  { %1500 = vmatprep.subr.bf16.mxu0 %v2744_v50  ;;  %1664 = vmatprep.subr.bf16.mxu1 %v2746_v51  ;;  %v2841_v50 = vld [vmem:[#allocation5 + $0x36c] ss:$16 sps:$4 sm:$0xff]   ;;  %v2836_v51 = vld [vmem:[#allocation5 + $0x360] ss:$16 sps:$4 sm:$0xff]  }
  0x7c   :  { %1501 = vmatpush1.bf16.msra.mxu0 %v2748_v52  ;;  %1665 = vmatpush1.bf16.msra.mxu1 %v2749_v53  ;;  %v2839_v52 = vld [vmem:[#allocation5 + $0x368] ss:$16 sps:$4 sm:$0xff]   ;;  %v2844_v53 = vld [vmem:[#allocation5 + $0x384] ss:$16 sps:$4 sm:$0xff]  }
  0x7d   :  { %1502 = vmatprep.subr.bf16.mxu0 %v2750_v54  ;;  %1666 = vmatprep.subr.bf16.mxu1 %v2752_v55  ;;  %v2847_v54 = vld [vmem:[#allocation5 + $0x38c] ss:$16 sps:$4 sm:$0xff]   ;;  %v2842_v55 = vld [vmem:[#allocation5 + $0x380] ss:$16 sps:$4 sm:$0xff]  }
  0x80   :  { %1503 = vmatpush1.bf16.msra.mxu0 %v2754_v56  ;;  %1667 = vmatpush1.bf16.msra.mxu1 %v2755_v57  ;;  %v2845_v56 = vld [vmem:[#allocation5 + $0x388] ss:$16 sps:$4 sm:$0xff]   ;;  %v2850_v57 = vld [vmem:[#allocation5 + $0x3a4] ss:$16 sps:$4 sm:$0xff]  }
  0x81   :  { %1504 = vmatprep.subr.bf16.mxu0 %v2756_v58  ;;  %1668 = vmatprep.subr.bf16.mxu1 %v2758_v59  ;;  %v2853_v58 = vld [vmem:[#allocation5 + $0x3ac] ss:$16 sps:$4 sm:$0xff]   ;;  %v2848_v59 = vld [vmem:[#allocation5 + $0x3a0] ss:$16 sps:$4 sm:$0xff]  }
  0x84   :  { %1505 = vmatpush1.bf16.msra.mxu0 %v2760_v60  ;;  %1669 = vmatpush1.bf16.msra.mxu1 %v2761_v61  ;;  %v2851_v60 = vld [vmem:[#allocation5 + $0x3a8] ss:$16 sps:$4 sm:$0xff]   ;;  %v2856_v61 = vld [vmem:[#allocation5 + $0x3c4] ss:$16 sps:$4 sm:$0xff]  }
  0x85   :  { %1506 = vmatprep.subr.bf16.mxu0 %v2762_v62  ;;  %1670 = vmatprep.subr.bf16.mxu1 %v2764_v63  ;;  %v2859_v62 = vld [vmem:[#allocation5 + $0x3cc] ss:$16 sps:$4 sm:$0xff]   ;;  %v2854_v63 = vld [vmem:[#allocation5 + $0x3c0] ss:$16 sps:$4 sm:$0xff]  }
  0x88   :  { %1507 = vmatpush1.bf16.msra.mxu0 %v2766_v0  ;;  %1671 = vmatpush1.bf16.msra.mxu1 %v2767_v1  ;;  %v2857_v0 = vld [vmem:[#allocation5 + $0x3c8] ss:$16 sps:$4 sm:$0xff]   ;;  %v2862_v1 = vld [vmem:[#allocation5 + $0x3e4] ss:$16 sps:$4 sm:$0xff]  }
  0x89   :  { %1517 = vmatprep.subr.bf16.mxu0 %v2772_v2  ;;  %1681 = vmatprep.subr.bf16.mxu1 %v2775_v3  ;;  %v2865_v2 = vld [vmem:[#allocation5 + $0x3ec] ss:$16 sps:$4 sm:$0xff]   ;;  %v2860_v3 = vld [vmem:[#allocation5 + $0x3e0] ss:$16 sps:$4 sm:$0xff]  }
  0x8b   :  { %1509 = vmatmul.mubr.bf16.vlgmr.msra.gmra.mrb[0].mxu0 %v2286_v4  ;;  %1673 = vmatmul.mubr.bf16.vlgmr.msra.gmra.mrb[0].mxu1 %v2286_v4  ;;  %v2863_v4 = vld [vmem:[#allocation5 + $0x3e8] ss:$16 sps:$4 sm:$0xff]  }
  0x8c   :  { %1518 = vmatpush1.bf16.msra.mxu0 %v2770_v5  ;;  %1682 = vmatpush1.bf16.msra.mxu1 %v2773_v6  ;;  %v2870_v5 = vld [vmem:[#allocation5 + $0x404] ss:$16 sps:$4 sm:$0xff]   ;;  %v2873_v6 = vld [vmem:[#allocation5 + $0x40c] ss:$16 sps:$4 sm:$0xff]  }
  0x8d   :  { %1519 = vmatprep.subr.bf16.mxu0 %v2778_v7  ;;  %1683 = vmatprep.subr.bf16.mxu1 %v2781_v8  ;;  %v2288_v7 = vcombine.low %v3273_v29, %v3273_v29  ;;  %v2868_v8 = vld [vmem:[#allocation5 + $0x400] ss:$16 sps:$4 sm:$0xff]   ;;  %v2903_v29 = vld [vmem:[#allocation5 + $0x4ac] ss:$16 sps:$4 sm:$0xff]  }
  0x8e   :  { %1549 = vmatprep.mubr.bf16.mxu0 %v2289_v30  ;;  %1713 = vmatprep.mubr.bf16.mxu1 %v2289_v30  ;;  %v2898_v30 = vld [vmem:[#allocation5 + $0x4a0] ss:$16 sps:$4 sm:$0xff]  }
  0x90   :  { %1520 = vmatpush1.bf16.msra.mxu0 %v2776_v9  ;;  %1684 = vmatpush1.bf16.msra.mxu1 %v2779_v10  ;;  %v2871_v9 = vld [vmem:[#allocation5 + $0x408] ss:$16 sps:$4 sm:$0xff]   ;;  %v2876_v10 = vld [vmem:[#allocation5 + $0x424] ss:$16 sps:$4 sm:$0xff]  }
  0x91   :  { %1521 = vmatprep.subr.bf16.mxu0 %v2784_v11  ;;  %1685 = vmatprep.subr.bf16.mxu1 %v2787_v12  ;;  %v3279_v11 = vld [vmem:[#allocation2 + $0x10] sm:$0xff]  ;;  %v2879_v12 = vld [vmem:[#allocation5 + $0x42c] ss:$16 sps:$4 sm:$0xff]  }
  0x94   :  { %1522 = vmatpush1.bf16.msra.mxu0 %v2782_v13  ;;  %1686 = vmatpush1.bf16.msra.mxu1 %v2785_v14  ;;  %v2291_v13 = vcombine.high %v3279_v11, %v3279_v11  ;;  %v2874_v14 = vld [vmem:[#allocation5 + $0x420] ss:$16 sps:$4 sm:$0xff]  }
  0x95   :  { %1523 = vmatprep.subr.bf16.mxu0 %v2790_v15  ;;  %1687 = vmatprep.subr.bf16.mxu1 %v2793_v16  ;;  %v2877_v15 = vld [vmem:[#allocation5 + $0x428] ss:$16 sps:$4 sm:$0xff]   ;;  %v2882_v16 = vld [vmem:[#allocation5 + $0x444] ss:$16 sps:$4 sm:$0xff]  }
  0x98   :  { %1524 = vmatpush1.bf16.msra.mxu0 %v2788_v17  ;;  %1688 = vmatpush1.bf16.msra.mxu1 %v2791_v18  ;;  %v2885_v17 = vld [vmem:[#allocation5 + $0x44c] ss:$16 sps:$4 sm:$0xff]   ;;  %v2880_v18 = vld [vmem:[#allocation5 + $0x440] ss:$16 sps:$4 sm:$0xff]  }
  0x99   :  { %1525 = vmatprep.subr.bf16.mxu0 %v2796_v19  ;;  %1689 = vmatprep.subr.bf16.mxu1 %v2799_v20  ;;  %v2883_v19 = vld [vmem:[#allocation5 + $0x448] ss:$16 sps:$4 sm:$0xff]   ;;  %v2888_v20 = vld [vmem:[#allocation5 + $0x464] ss:$16 sps:$4 sm:$0xff]  }
  0x9c   :  { %1526 = vmatpush1.bf16.msra.mxu0 %v2794_v21  ;;  %1690 = vmatpush1.bf16.msra.mxu1 %v2797_v22  ;;  %v2891_v21 = vld [vmem:[#allocation5 + $0x46c] ss:$16 sps:$4 sm:$0xff]   ;;  %v2886_v22 = vld [vmem:[#allocation5 + $0x460] ss:$16 sps:$4 sm:$0xff]  }
  0x9d   :  { %1527 = vmatprep.subr.bf16.mxu0 %v2802_v23  ;;  %1691 = vmatprep.subr.bf16.mxu1 %v2805_v24  ;;  %v2889_v23 = vld [vmem:[#allocation5 + $0x468] ss:$16 sps:$4 sm:$0xff]   ;;  %v2894_v24 = vld [vmem:[#allocation5 + $0x484] ss:$16 sps:$4 sm:$0xff]  }
  0xa0   :  { %1528 = vmatpush1.bf16.msra.mxu0 %v2800_v25  ;;  %1692 = vmatpush1.bf16.msra.mxu1 %v2803_v26  ;;  %v2897_v25 = vld [vmem:[#allocation5 + $0x48c] ss:$16 sps:$4 sm:$0xff]   ;;  %v2892_v26 = vld [vmem:[#allocation5 + $0x480] ss:$16 sps:$4 sm:$0xff]  }
  0xa1   :  { %1529 = vmatprep.subr.bf16.mxu0 %v2808_v27  ;;  %1693 = vmatprep.subr.bf16.mxu1 %v2811_v28  ;;  %v2895_v27 = vld [vmem:[#allocation5 + $0x488] ss:$16 sps:$4 sm:$0xff]   ;;  %v2900_v28 = vld [vmem:[#allocation5 + $0x4a4] ss:$16 sps:$4 sm:$0xff]  }
  0xa4   :  { %1530 = vmatpush1.bf16.msra.mxu0 %v2806_v31  ;;  %1694 = vmatpush1.bf16.msra.mxu1 %v2809_v32  ;;  %v2901_v31 = vld [vmem:[#allocation5 + $0x4a8] ss:$16 sps:$4 sm:$0xff]   ;;  %v2906_v32 = vld [vmem:[#allocation5 + $0x4c4] ss:$16 sps:$4 sm:$0xff]  }
  0xa5   :  { %1531 = vmatprep.subr.bf16.mxu0 %v2814_v33  ;;  %1695 = vmatprep.subr.bf16.mxu1 %v2817_v34  ;;  %v2909_v33 = vld [vmem:[#allocation5 + $0x4cc] ss:$16 sps:$4 sm:$0xff]   ;;  %v2904_v34 = vld [vmem:[#allocation5 + $0x4c0] ss:$16 sps:$4 sm:$0xff]  }
  0xa8   :  { %1532 = vmatpush1.bf16.msra.mxu0 %v2812_v35  ;;  %1696 = vmatpush1.bf16.msra.mxu1 %v2815_v36  ;;  %v2907_v35 = vld [vmem:[#allocation5 + $0x4c8] ss:$16 sps:$4 sm:$0xff]   ;;  %v2912_v36 = vld [vmem:[#allocation5 + $0x4e4] ss:$16 sps:$4 sm:$0xff]  }
  0xa9   :  { %1533 = vmatprep.subr.bf16.mxu0 %v2820_v37  ;;  %1697 = vmatprep.subr.bf16.mxu1 %v2823_v38  ;;  %v2915_v37 = vld [vmem:[#allocation5 + $0x4ec] ss:$16 sps:$4 sm:$0xff]   ;;  %v2910_v38 = vld [vmem:[#allocation5 + $0x4e0] ss:$16 sps:$4 sm:$0xff]  }
  0xac   :  { %1534 = vmatpush1.bf16.msra.mxu0 %v2818_v39  ;;  %1698 = vmatpush1.bf16.msra.mxu1 %v2821_v40  ;;  %v2913_v39 = vld [vmem:[#allocation5 + $0x4e8] ss:$16 sps:$4 sm:$0xff]   ;;  %v2918_v40 = vld [vmem:[#allocation5 + $0x504] ss:$16 sps:$4 sm:$0xff]  }
  0xad   :  { %1535 = vmatprep.subr.bf16.mxu0 %v2826_v41  ;;  %1699 = vmatprep.subr.bf16.mxu1 %v2829_v42  ;;  %v2921_v41 = vld [vmem:[#allocation5 + $0x50c] ss:$16 sps:$4 sm:$0xff]   ;;  %v2916_v42 = vld [vmem:[#allocation5 + $0x500] ss:$16 sps:$4 sm:$0xff]  }
  0xb0   :  { %1536 = vmatpush1.bf16.msra.mxu0 %v2824_v43  ;;  %1700 = vmatpush1.bf16.msra.mxu1 %v2827_v44  ;;  %v2919_v43 = vld [vmem:[#allocation5 + $0x508] ss:$16 sps:$4 sm:$0xff]   ;;  %v2924_v44 = vld [vmem:[#allocation5 + $0x524] ss:$16 sps:$4 sm:$0xff]  }
  0xb1   :  { %1537 = vmatprep.subr.bf16.mxu0 %v2832_v45  ;;  %1701 = vmatprep.subr.bf16.mxu1 %v2835_v46  ;;  %v2927_v45 = vld [vmem:[#allocation5 + $0x52c] ss:$16 sps:$4 sm:$0xff]   ;;  %v2922_v46 = vld [vmem:[#allocation5 + $0x520] ss:$16 sps:$4 sm:$0xff]  }
  0xb4   :  { %1538 = vmatpush1.bf16.msra.mxu0 %v2830_v47  ;;  %1702 = vmatpush1.bf16.msra.mxu1 %v2833_v48  ;;  %v2925_v47 = vld [vmem:[#allocation5 + $0x528] ss:$16 sps:$4 sm:$0xff]   ;;  %v2930_v48 = vld [vmem:[#allocation5 + $0x544] ss:$16 sps:$4 sm:$0xff]  }
  0xb5   :  { %1539 = vmatprep.subr.bf16.mxu0 %v2838_v49  ;;  %1703 = vmatprep.subr.bf16.mxu1 %v2841_v50  ;;  %v2933_v49 = vld [vmem:[#allocation5 + $0x54c] ss:$16 sps:$4 sm:$0xff]   ;;  %v2928_v50 = vld [vmem:[#allocation5 + $0x540] ss:$16 sps:$4 sm:$0xff]  }
  0xb8   :  { %1540 = vmatpush1.bf16.msra.mxu0 %v2836_v51  ;;  %1704 = vmatpush1.bf16.msra.mxu1 %v2839_v52  ;;  %v2931_v51 = vld [vmem:[#allocation5 + $0x548] ss:$16 sps:$4 sm:$0xff]   ;;  %v2936_v52 = vld [vmem:[#allocation5 + $0x564] ss:$16 sps:$4 sm:$0xff]  }
  0xb9   :  { %1541 = vmatprep.subr.bf16.mxu0 %v2844_v53  ;;  %1705 = vmatprep.subr.bf16.mxu1 %v2847_v54  ;;  %v2939_v53 = vld [vmem:[#allocation5 + $0x56c] ss:$16 sps:$4 sm:$0xff]   ;;  %v2934_v54 = vld [vmem:[#allocation5 + $0x560] ss:$16 sps:$4 sm:$0xff]  }
  0xbc   :  { %1542 = vmatpush1.bf16.msra.mxu0 %v2842_v55  ;;  %1706 = vmatpush1.bf16.msra.mxu1 %v2845_v56  ;;  %v2937_v55 = vld [vmem:[#allocation5 + $0x568] ss:$16 sps:$4 sm:$0xff]   ;;  %v2942_v56 = vld [vmem:[#allocation5 + $0x584] ss:$16 sps:$4 sm:$0xff]  }
  0xbd   :  { %1543 = vmatprep.subr.bf16.mxu0 %v2850_v57  ;;  %1707 = vmatprep.subr.bf16.mxu1 %v2853_v58  ;;  %v2945_v57 = vld [vmem:[#allocation5 + $0x58c] ss:$16 sps:$4 sm:$0xff]   ;;  %v2940_v58 = vld [vmem:[#allocation5 + $0x580] ss:$16 sps:$4 sm:$0xff]  }
  0xc0   :  { %1544 = vmatpush1.bf16.msra.mxu0 %v2848_v59  ;;  %1708 = vmatpush1.bf16.msra.mxu1 %v2851_v60  ;;  %v2943_v59 = vld [vmem:[#allocation5 + $0x588] ss:$16 sps:$4 sm:$0xff]   ;;  %v2948_v60 = vld [vmem:[#allocation5 + $0x5a4] ss:$16 sps:$4 sm:$0xff]  }
  0xc1   :  { %1545 = vmatprep.subr.bf16.mxu0 %v2856_v61  ;;  %1709 = vmatprep.subr.bf16.mxu1 %v2859_v62  ;;  %v2951_v61 = vld [vmem:[#allocation5 + $0x5ac] ss:$16 sps:$4 sm:$0xff]   ;;  %v2946_v62 = vld [vmem:[#allocation5 + $0x5a0] ss:$16 sps:$4 sm:$0xff]  }
  0xc4   :  { %1546 = vmatpush1.bf16.msra.mxu0 %v2854_v63  ;;  %1710 = vmatpush1.bf16.msra.mxu1 %v2857_v0  ;;  %v2949_v63 = vld [vmem:[#allocation5 + $0x5a8] ss:$16 sps:$4 sm:$0xff]   ;;  %v2954_v0 = vld [vmem:[#allocation5 + $0x5c4] ss:$16 sps:$4 sm:$0xff]  }
  0xc5   :  { %1547 = vmatprep.subr.bf16.mxu0 %v2862_v1  ;;  %1711 = vmatprep.subr.bf16.mxu1 %v2865_v2  ;;  %v2957_v1 = vld [vmem:[#allocation5 + $0x5cc] ss:$16 sps:$4 sm:$0xff]   ;;  %v2952_v2 = vld [vmem:[#allocation5 + $0x5c0] ss:$16 sps:$4 sm:$0xff]  }
  0xc8   :  { %1548 = vmatpush1.bf16.msra.mxu0 %v2860_v3  ;;  %1712 = vmatpush1.bf16.msra.mxu1 %v2863_v4  ;;  %v2955_v3 = vld [vmem:[#allocation5 + $0x5c8] ss:$16 sps:$4 sm:$0xff]   ;;  %v2960_v4 = vld [vmem:[#allocation5 + $0x5e4] ss:$16 sps:$4 sm:$0xff]  }
  0xc9   :  { %1558 = vmatprep.subr.bf16.mxu0 %v2870_v5  ;;  %1722 = vmatprep.subr.bf16.mxu1 %v2873_v6  ;;  %v2963_v5 = vld [vmem:[#allocation5 + $0x5ec] ss:$16 sps:$4 sm:$0xff]   ;;  %v2958_v6 = vld [vmem:[#allocation5 + $0x5e0] ss:$16 sps:$4 sm:$0xff]  }
  0xcb   :  { %1550 = vmatmul.mubr.bf16.vlgmr.msra.gmra.mrb[0].mxu0 %v2288_v7  ;;  %1714 = vmatmul.mubr.bf16.vlgmr.msra.gmra.mrb[0].mxu1 %v2288_v7  ;;  %v2961_v7 = vld [vmem:[#allocation5 + $0x5e8] ss:$16 sps:$4 sm:$0xff]  }
  0xcc   :  { %1559 = vmatpush1.bf16.msra.mxu0 %v2868_v8  ;;  %1723 = vmatpush1.bf16.msra.mxu1 %v2871_v9  ;;  %v2968_v8 = vld [vmem:[#allocation5 + $0x604] ss:$16 sps:$4 sm:$0xff]   ;;  %v2971_v9 = vld [vmem:[#allocation5 + $0x60c] ss:$16 sps:$4 sm:$0xff]  }
  0xcd   :  { %1560 = vmatprep.subr.bf16.mxu0 %v2876_v10  ;;  %1724 = vmatprep.subr.bf16.mxu1 %v2879_v12  ;;  %v2290_v10 = vcombine.low %v3279_v11, %v3279_v11  ;;  %v2966_v12 = vld [vmem:[#allocation5 + $0x600] ss:$16 sps:$4 sm:$0xff]  }
  0xce   :  { %1590 = vmatprep.mubr.bf16.mxu0 %v2291_v13  ;;  %1754 = vmatprep.mubr.bf16.mxu1 %v2291_v13  ;;  %v2969_v13 = vld [vmem:[#allocation5 + $0x608] ss:$16 sps:$4 sm:$0xff]   ;;  %v2978_v11 = vld [vmem:[#allocation5 + $0x640] ss:$16 sps:$4 sm:$0xff]  }
  0xd0   :  { %1561 = vmatpush1.bf16.msra.mxu0 %v2874_v14  ;;  %1725 = vmatpush1.bf16.msra.mxu1 %v2877_v15  ;;  %v2974_v14 = vld [vmem:[#allocation5 + $0x624] ss:$16 sps:$4 sm:$0xff]   ;;  %v2977_v15 = vld [vmem:[#allocation5 + $0x62c] ss:$16 sps:$4 sm:$0xff]  }
  0xd1   :  { %1562 = vmatprep.subr.bf16.mxu0 %v2882_v16  ;;  %1726 = vmatprep.subr.bf16.mxu1 %v2885_v17  ;;  %v2972_v16 = vld [vmem:[#allocation5 + $0x620] ss:$16 sps:$4 sm:$0xff]   ;;  %v2975_v17 = vld [vmem:[#allocation5 + $0x628] ss:$16 sps:$4 sm:$0xff]  }
  0xd4   :  { %1563 = vmatpush1.bf16.msra.mxu0 %v2880_v18  ;;  %1727 = vmatpush1.bf16.msra.mxu1 %v2883_v19  ;;  %v2980_v18 = vld [vmem:[#allocation5 + $0x644] ss:$16 sps:$4 sm:$0xff]   ;;  %v2983_v19 = vld [vmem:[#allocation5 + $0x64c] ss:$16 sps:$4 sm:$0xff]  }
  0xd5   :  { %1564 = vmatprep.subr.bf16.mxu0 %v2888_v20  ;;  %1728 = vmatprep.subr.bf16.mxu1 %v2891_v21  ;;  %v3181_v20 = vmov 0   ;;  %v2981_v21 = vld [vmem:[#allocation5 + $0x648] ss:$16 sps:$4 sm:$0xff]  }
  0xd8   :  { %1565 = vmatpush1.bf16.msra.mxu0 %v2886_v22  ;;  %1729 = vmatpush1.bf16.msra.mxu1 %v2889_v23  ;;  %v2986_v22 = vld [vmem:[#allocation5 + $0x664] ss:$16 sps:$4 sm:$0xff]   ;;  %v2989_v23 = vld [vmem:[#allocation5 + $0x66c] ss:$16 sps:$4 sm:$0xff]  }
  0xd9   :  { %1566 = vmatprep.subr.bf16.mxu0 %v2894_v24  ;;  %1730 = vmatprep.subr.bf16.mxu1 %v2897_v25  ;;  %v2984_v24 = vld [vmem:[#allocation5 + $0x660] ss:$16 sps:$4 sm:$0xff]   ;;  %v2987_v25 = vld [vmem:[#allocation5 + $0x668] ss:$16 sps:$4 sm:$0xff]  }
  0xdc   :  { %1567 = vmatpush1.bf16.msra.mxu0 %v2892_v26  ;;  %1731 = vmatpush1.bf16.msra.mxu1 %v2895_v27  ;;  %v2992_v26 = vld [vmem:[#allocation5 + $0x684] ss:$16 sps:$4 sm:$0xff]   ;;  %v2995_v27 = vld [vmem:[#allocation5 + $0x68c] ss:$16 sps:$4 sm:$0xff]  }
  0xdd   :  { %1568 = vmatprep.subr.bf16.mxu0 %v2900_v28  ;;  %1732 = vmatprep.subr.bf16.mxu1 %v2903_v29  ;;  %v2990_v28 = vld [vmem:[#allocation5 + $0x680] ss:$16 sps:$4 sm:$0xff]   ;;  %v2993_v29 = vld [vmem:[#allocation5 + $0x688] ss:$16 sps:$4 sm:$0xff]  }
  0xe0   :  { %1569 = vmatpush1.bf16.msra.mxu0 %v2898_v30  ;;  %1733 = vmatpush1.bf16.msra.mxu1 %v2901_v31  ;;  %v2998_v30 = vld [vmem:[#allocation5 + $0x6a4] ss:$16 sps:$4 sm:$0xff]   ;;  %v3001_v31 = vld [vmem:[#allocation5 + $0x6ac] ss:$16 sps:$4 sm:$0xff]  }
  0xe1   :  { %1570 = vmatprep.subr.bf16.mxu0 %v2906_v32  ;;  %1734 = vmatprep.subr.bf16.mxu1 %v2909_v33  ;;  %v2996_v32 = vld [vmem:[#allocation5 + $0x6a0] ss:$16 sps:$4 sm:$0xff]   ;;  %v2999_v33 = vld [vmem:[#allocation5 + $0x6a8] ss:$16 sps:$4 sm:$0xff]  }
  0xe4   :  { %1571 = vmatpush1.bf16.msra.mxu0 %v2904_v34  ;;  %1735 = vmatpush1.bf16.msra.mxu1 %v2907_v35  ;;  %v3004_v34 = vld [vmem:[#allocation5 + $0x6c4] ss:$16 sps:$4 sm:$0xff]   ;;  %v3007_v35 = vld [vmem:[#allocation5 + $0x6cc] ss:$16 sps:$4 sm:$0xff]  }
  0xe5   :  { %1572 = vmatprep.subr.bf16.mxu0 %v2912_v36  ;;  %1736 = vmatprep.subr.bf16.mxu1 %v2915_v37  ;;  %v3002_v36 = vld [vmem:[#allocation5 + $0x6c0] ss:$16 sps:$4 sm:$0xff]   ;;  %v3005_v37 = vld [vmem:[#allocation5 + $0x6c8] ss:$16 sps:$4 sm:$0xff]  }
  0xe8   :  { %1573 = vmatpush1.bf16.msra.mxu0 %v2910_v38  ;;  %1737 = vmatpush1.bf16.msra.mxu1 %v2913_v39  ;;  %v3010_v38 = vld [vmem:[#allocation5 + $0x6e4] ss:$16 sps:$4 sm:$0xff]   ;;  %v3013_v39 = vld [vmem:[#allocation5 + $0x6ec] ss:$16 sps:$4 sm:$0xff]  }
  0xe9   :  { %1574 = vmatprep.subr.bf16.mxu0 %v2918_v40  ;;  %1738 = vmatprep.subr.bf16.mxu1 %v2921_v41  ;;  %v3008_v40 = vld [vmem:[#allocation5 + $0x6e0] ss:$16 sps:$4 sm:$0xff]   ;;  %v3011_v41 = vld [vmem:[#allocation5 + $0x6e8] ss:$16 sps:$4 sm:$0xff]  }
  0xec   :  { %1575 = vmatpush1.bf16.msra.mxu0 %v2916_v42  ;;  %1739 = vmatpush1.bf16.msra.mxu1 %v2919_v43  ;;  %v3015_v42 = vld [vmem:[#allocation7 + $0x40] sm:$0xff]  }
  0xed   :  { %1576 = vmatprep.subr.bf16.mxu0 %v2924_v44  ;;  %1740 = vmatprep.subr.bf16.mxu1 %v2927_v45  ;;  %v3016_v43 = vld [vmem:[#allocation7 + $0xc0] sm:$0xff]   ;;  %v3014_v44 = vld [vmem:[#allocation2 + $0x18] ss:$0 sps:$4 sm:$0xff]  }
  0xee   :  { %v3017_v45 = vld [vmem:[#allocation7] sm:$0xff]  }
  0xf0   :  { %1577 = vmatpush1.bf16.msra.mxu0 %v2922_v46  ;;  %1741 = vmatpush1.bf16.msra.mxu1 %v2925_v47  ;;  %v3018_v46 = vld [vmem:[#allocation7 + $0x80] sm:$0xff]   ;;  %v3019_v47 = vld [vmem:[#allocation7 + $0x48] sm:$0xff]  }
  0xf1   :  { %1578 = vmatprep.subr.bf16.mxu0 %v2930_v48  ;;  %1742 = vmatprep.subr.bf16.mxu1 %v2933_v49  ;;  %v3020_v48 = vld [vmem:[#allocation7 + $0xc8] sm:$0xff]  }
  0xf2   :  { %v3021_v49 = vld [vmem:[#allocation7 + $0x8] sm:$0xff]  }
  0xf4   :  { %1579 = vmatpush1.bf16.msra.mxu0 %v2928_v50  ;;  %1743 = vmatpush1.bf16.msra.mxu1 %v2931_v51  ;;  %v3022_v50 = vld [vmem:[#allocation7 + $0x88] sm:$0xff]   ;;  %v3023_v51 = vld [vmem:[#allocation7 + $0x50] sm:$0xff]  }
  0xf5   :  { %1580 = vmatprep.subr.bf16.mxu0 %v2936_v52  ;;  %1744 = vmatprep.subr.bf16.mxu1 %v2939_v53  ;;  %v3024_v52 = vld [vmem:[#allocation7 + $0xd0] sm:$0xff]  }
  0xf6   :  { %v3025_v53 = vld [vmem:[#allocation7 + $0x10] sm:$0xff]  }
  0xf8   :  { %1581 = vmatpush1.bf16.msra.mxu0 %v2934_v54  ;;  %1745 = vmatpush1.bf16.msra.mxu1 %v2937_v55  ;;  %v3026_v54 = vld [vmem:[#allocation7 + $0x90] sm:$0xff]   ;;  %v3027_v55 = vld [vmem:[#allocation7 + $0x58] sm:$0xff]  }
  0xf9   :  { %1582 = vmatprep.subr.bf16.mxu0 %v2942_v56  ;;  %1746 = vmatprep.subr.bf16.mxu1 %v2945_v57  ;;  %v3028_v56 = vld [vmem:[#allocation7 + $0xd8] sm:$0xff]  }
  0xfa   :  { %v3029_v57 = vld [vmem:[#allocation7 + $0x18] sm:$0xff]  }
  0xfc   :  { %1583 = vmatpush1.bf16.msra.mxu0 %v2940_v58  ;;  %1747 = vmatpush1.bf16.msra.mxu1 %v2943_v59  ;;  %v3030_v58 = vld [vmem:[#allocation7 + $0x98] sm:$0xff]   ;;  %v3031_v59 = vld [vmem:[#allocation7 + $0x60] sm:$0xff]  }
  0xfd   :  { %1584 = vmatprep.subr.bf16.mxu0 %v2948_v60  ;;  %1748 = vmatprep.subr.bf16.mxu1 %v2951_v61  ;;  %v3032_v60 = vld [vmem:[#allocation7 + $0xe0] sm:$0xff]  }
  0xfe   :  { %v3033_v61 = vld [vmem:[#allocation7 + $0x20] sm:$0xff]  }
 0x100   :  { %1585 = vmatpush1.bf16.msra.mxu0 %v2946_v62  ;;  %1749 = vmatpush1.bf16.msra.mxu1 %v2949_v63  ;;  %v3034_v62 = vld [vmem:[#allocation7 + $0xa0] sm:$0xff]   ;;  %v3035_v63 = vld [vmem:[#allocation7 + $0x68] sm:$0xff]  }
 0x101   :  { %1586 = vmatprep.subr.bf16.mxu0 %v2954_v0  ;;  %1750 = vmatprep.subr.bf16.mxu1 %v2957_v1  ;;  %v3036_v0 = vld [vmem:[#allocation7 + $0xe8] sm:$0xff]  }
 0x102   :  { %v3037_v1 = vld [vmem:[#allocation7 + $0x28] sm:$0xff]  }
 0x104   :  { %1587 = vmatpush1.bf16.msra.mxu0 %v2952_v2  ;;  %1751 = vmatpush1.bf16.msra.mxu1 %v2955_v3  ;;  %v3038_v2 = vld [vmem:[#allocation7 + $0xa8] sm:$0xff]   ;;  %v3039_v3 = vld [vmem:[#allocation7 + $0x70] sm:$0xff]  }
 0x105   :  { %1588 = vmatprep.subr.bf16.mxu0 %v2960_v4  ;;  %1752 = vmatprep.subr.bf16.mxu1 %v2963_v5  ;;  %v3040_v4 = vld [vmem:[#allocation7 + $0xf0] sm:$0xff]  }
 0x106   :  { %v3041_v5 = vld [vmem:[#allocation7 + $0x30] sm:$0xff]  }
 0x108   :  { %1589 = vmatpush1.bf16.msra.mxu0 %v2958_v6  ;;  %1753 = vmatpush1.bf16.msra.mxu1 %v2961_v7  ;;  %v3042_v6 = vld [vmem:[#allocation7 + $0xb0] sm:$0xff]   ;;  %v3043_v7 = vld [vmem:[#allocation7 + $0x78] sm:$0xff]  }
 0x109   :  { %1599 = vmatprep.subr.bf16.mxu0 %v2968_v8  ;;  %1763 = vmatprep.subr.bf16.mxu1 %v2971_v9  ;;  %v3044_v8 = vld [vmem:[#allocation7 + $0xf8] sm:$0xff]  }
 0x10a   :  { %v3045_v9 = vld [vmem:[#allocation7 + $0x38] sm:$0xff]  }
 0x10b   :  { %1591 = vmatmul.mubr.bf16.vlgmr.msra.gmra.mrb[0].mxu0 %v2290_v10  ;;  %1755 = vmatmul.mubr.bf16.vlgmr.msra.gmra.mrb[0].mxu1 %v2290_v10  ;;  %v3046_v10 = vld [vmem:[#allocation7 + $0xb8] sm:$0xff]  }
 0x10c   :  { %1600 = vmatpush1.bf16.msra.mxu0 %v2966_v12  ;;  %1764 = vmatpush1.bf16.msra.mxu1 %v2969_v13  ;;  %v3182_v12 = vmov 0.0   ;;  %v311_v13 = vlaneseq }
 0x10d   :  { %1601 = vmatprep.subr.bf16.mxu0 %v2974_v14  ;;  %1765 = vmatprep.subr.bf16.mxu1 %v2977_v15 }
 0x10e   :  { %1631 = vmatprep.mubr.bf16.mxu0 %v3181_v20  ;;  %1795 = vmatprep.mubr.bf16.mxu1 %v3181_v20  ;;  %v312_v14 = vshrl.u32 %v311_v13, 7 }
 0x110   :  { %1602 = vmatpush1.bf16.msra.mxu0 %v2972_v16  ;;  %1766 = vmatpush1.bf16.msra.mxu1 %v2975_v17  ;;  %v313_v15 = vsub.s32 0, %v312_v14  ;;  %v321_v16 = vsub.s32 2, %v312_v14  ;;  %v309_v17 = vld [vmem:[%s3308_s2] sm:$0xf] }
 0x111   :  { %1603 = vmatprep.subr.bf16.mxu0 %v2980_v18  ;;  %1767 = vmatprep.subr.bf16.mxu1 %v2983_v19  ;;  %v317_v18 = vsub.s32 1, %v312_v14  ;;  %v325_v19 = vsub.s32 3, %v312_v14 }
 0x112   :  { %v314_v20 = vrot.slane %v309_v17, %v313_v15 }
 0x114   :  { %1604 = vmatpush1.bf16.msra.mxu0 %v2978_v11  ;;  %1768 = vmatpush1.bf16.msra.mxu1 %v2981_v21  ;;  %v322_v11 = vrot.slane %v309_v17, %v321_v16  ;;  %v318_v21 = vrot.slane %v309_v17, %v317_v18 }
 0x115   :  { %1605 = vmatprep.subr.bf16.mxu0 %v2986_v22  ;;  %1769 = vmatprep.subr.bf16.mxu1 %v2989_v23  ;;  %v326_v22 = vrot.slane %v309_v17, %v325_v19 }
 0x118   :  { %1606 = vmatpush1.bf16.msra.mxu0 %v2984_v24  ;;  %1770 = vmatpush1.bf16.msra.mxu1 %v2987_v25 }
 0x119   :  { %1607 = vmatprep.subr.bf16.mxu0 %v2992_v26  ;;  %1771 = vmatprep.subr.bf16.mxu1 %v2995_v27 }
 0x11c   :  { %1608 = vmatpush1.bf16.msra.mxu0 %v2990_v28  ;;  %1772 = vmatpush1.bf16.msra.mxu1 %v2993_v29 }
 0x11d   :  { %1609 = vmatprep.subr.bf16.mxu0 %v2998_v30  ;;  %1773 = vmatprep.subr.bf16.mxu1 %v3001_v31 }
 0x120   :  { %1610 = vmatpush1.bf16.msra.mxu0 %v2996_v32  ;;  %1774 = vmatpush1.bf16.msra.mxu1 %v2999_v33 }
 0x121   :  { %1611 = vmatprep.subr.bf16.mxu0 %v3004_v34  ;;  %1775 = vmatprep.subr.bf16.mxu1 %v3007_v35 }
 0x124   :  { %1612 = vmatpush1.bf16.msra.mxu0 %v3002_v36  ;;  %1776 = vmatpush1.bf16.msra.mxu1 %v3005_v37 }
 0x125   :  { %1613 = vmatprep.subr.bf16.mxu0 %v3010_v38  ;;  %1777 = vmatprep.subr.bf16.mxu1 %v3013_v39 }
 0x128   :  { %1614 = vmatpush1.bf16.msra.mxu0 %v3008_v40  ;;  %1778 = vmatpush1.bf16.msra.mxu1 %v3011_v41  ;;  %v3047_v41 = vld [vmem:[#allocation8] sm:$0xff]  }
 0x129   :  { %2559 = vmatprep.subr.bf16.mxu0 %v3015_v42  ;;  %2581 = vmatprep.subr.bf16.mxu1 %v3016_v43 }
 0x12b   :  { %1632 = vmatmul.mubr.bf16.vlgmr.msra.gmra.mrb[0].mxu0 %v3014_v44  ;;  %1796 = vmatmul.mubr.bf16.vlgmr.msra.gmra.mrb[0].mxu1 %v3014_v44  ;;  %v3048_v44 = vld [vmem:[#allocation8 + $0x8] sm:$0xff]  }
 0x12c   :  { %2560 = vmatpush3.bf16.msra.mxu0 %v3017_v45  ;;  %2582 = vmatpush3.bf16.msra.mxu1 %v3018_v46  ;;  %v3049_v45 = vld [vmem:[#allocation8 + $0x10] sm:$0xff]   ;;  %v3050_v46 = vld [vmem:[#allocation8 + $0x18] sm:$0xff]  }
 0x12d   :  { %2561 = vmatprep.subr.bf16.mxu0 %v3019_v47  ;;  %2583 = vmatprep.subr.bf16.mxu1 %v3020_v48  ;;  %v3051_v47 = vld [vmem:[#allocation8 + $0x20] sm:$0xff]   ;;  %v3052_v48 = vld [vmem:[#allocation8 + $0x28] sm:$0xff]  }
 0x130   :  { %2562 = vmatpush3.bf16.msra.mxu0 %v3021_v49  ;;  %2584 = vmatpush3.bf16.msra.mxu1 %v3022_v50  ;;  %v3053_v49 = vld [vmem:[#allocation8 + $0x30] sm:$0xff]   ;;  %v3054_v50 = vld [vmem:[#allocation8 + $0x38] sm:$0xff]  }
 0x131   :  { %2563 = vmatprep.subr.bf16.mxu0 %v3023_v51  ;;  %2585 = vmatprep.subr.bf16.mxu1 %v3024_v52 }
 0x134   :  { %2564 = vmatpush3.bf16.msra.mxu0 %v3025_v53  ;;  %2586 = vmatpush3.bf16.msra.mxu1 %v3026_v54  ;;  %v2517_v53 = vld [vmem:[%s3310_s4] ss:$0 sm:$0xff]  ;;  %s3143_s4 = scalar_lea.vmem %s2276_s8, 128 }
 0x135   :  { %2565 = vmatprep.subr.bf16.mxu0 %v3027_v55  ;;  %2587 = vmatprep.subr.bf16.mxu1 %v3028_v56  ;;  %p3144_p4 = scmp.ne.s32.totalorder %s2276_s8, %s3143_s4  ;;  %p3149_p6 = scmp.lt.s32.totalorder %s3143_s4, %s3143_s4 }
 0x137   :  { %p3150_p7 = por %p3149_p6, %p3148_p5 }
 0x138   :  { %2566 = vmatpush3.bf16.msra.mxu0 %v3029_v57  ;;  %2588 = vmatpush3.bf16.msra.mxu1 %v3030_v58 }
 0x139   :  { %2567 = vmatprep.subr.bf16.mxu0 %v3031_v59  ;;  %2589 = vmatprep.subr.bf16.mxu1 %v3032_v60  ;;  %p3151_p8 = pnand %p3150_p7, %p3144_p4 }
 0x13c   :  { %2568 = vmatpush3.bf16.msra.mxu0 %v3033_v61  ;;  %2590 = vmatpush3.bf16.msra.mxu1 %v3034_v62 }
 0x13d   :  { %2569 = vmatprep.subr.bf16.mxu0 %v3035_v63  ;;  %2591 = vmatprep.subr.bf16.mxu1 %v3036_v0 }
 0x140   :  { %2570 = vmatpush3.bf16.msra.mxu0 %v3037_v1  ;;  %2592 = vmatpush3.bf16.msra.mxu1 %v3038_v2  ;;  %v2550_v2 = vld [vmem:[%s3312_s6] ss:$0 sm:$0xff] }
 0x141   :  { %2571 = vmatprep.subr.bf16.mxu0 %v3039_v3  ;;  %2593 = vmatprep.subr.bf16.mxu1 %v3040_v4 }
 0x144   :  { %2572 = vmatpush3.bf16.msra.mxu0 %v3041_v5  ;;  %2594 = vmatpush3.bf16.msra.mxu1 %v3042_v6 }
 0x145   :  { %2573 = vmatprep.subr.bf16.mxu0 %v3043_v7  ;;  %2595 = vmatprep.subr.bf16.mxu1 %v3044_v8 }
 0x148   :  { %2574 = vmatpush3.bf16.msra.mxu0 %v3045_v9  ;;  %2596 = vmatpush3.bf16.msra.mxu1 %v3046_v10 }
 0x149   :  { %2612 = vmatprep.subr.bf16.mxu0 %v3182_v12 }
 0x1fe   :  { %v1633_v23 = vpop.f32.mrb[0].mxu0  ;;  %v1797_v24 = vpop.f32.mrb[0].mxu1 }
 0x1ff   :  { %v2632_v25 = vadd.f32 %v1633_v23, %v314_v20  ;;  %v2634_v26 = vadd.f32 %v1797_v24, %v322_v11  ;;  %v1635_v27 = vpop.f32.mrb[1].mxu0  ;;  %v1799_v28 = vpop.f32.mrb[1].mxu1 }
 0x200   :  { %v2633_v29 = vadd.f32 %v1635_v27, %v318_v21  ;;  %v2635_v30 = vadd.f32 %v1799_v28, %v326_v22  ;;  %v1637_v31 = vpop.f32.mrb[2].mxu0  ;;  %v1801_v32 = vpop.f32.mrb[2].mxu1 }
 0x201   :  { %v1804_v33 = vmax.f32 %v2632_v25, 0.0  ;;  %v1806_v34 = vmax.f32 %v2634_v26, 0.0  ;;  %v1638_v35 = vpop.f32.mrb[3].mxu0  ;;  %v1802_v36 = vpop.f32.mrb[3].mxu1 }
 0x202   :  { %v1805_v37 = vmax.f32 %v2633_v29, 0.0  ;;  %v1807_v38 = vmax.f32 %v2635_v30, 0.0 }
 0x203   :  { %v1808_v42 = vpack.c.bf16 %v1804_v33, %v1804_v33  ;;  %v1810_v43 = vpack.c.bf16 %v1806_v34, %v1806_v34 }
 0x204   :  { %v1809_v39 = vpack.c.bf16 %v1805_v37, %v1805_v37  ;;  %v1811_v40 = vpack.c.bf16 %v1807_v38, %v1807_v38 }
 0x206   :  { %2107 = vmatprep.mubr.bf16.mxu0 %v1809_v39  ;;  %2147 = vmatprep.mubr.bf16.mxu1 %v1811_v40 }
 0x207   :  { %2108 = vmatmul.mubr.bf16.vlgmr.msra.gmra.mrb[4].mxu0 %v1808_v42  ;;  %2148 = vmatmul.mubr.bf16.vlgmr.msra.gmra.mrb[4].mxu1 %v1810_v43 }
 0x208   :  { %2613 = vmatpush3.bf16.msra.mxu0 %v3047_v41  ;;  %2628 = vmatprep.mubr.msk.bf16.mxu0 %vm3183_vm0, %v3182_v12 }
 0x209   :  { %2614 = vmatprep.subr.bf16.mxu0 %v3182_v12 }
 0x20c   :  { %2615 = vmatpush3.bf16.msra.mxu0 %v3048_v44 }
 0x20d   :  { %2616 = vmatprep.subr.bf16.mxu0 %v3182_v12 }
 0x210   :  { %2617 = vmatpush3.bf16.msra.mxu0 %v3049_v45 }
 0x211   :  { %2618 = vmatprep.subr.bf16.mxu0 %v3182_v12 }
 0x214   :  { %2619 = vmatpush3.bf16.msra.mxu0 %v3050_v46 }
 0x215   :  { %2620 = vmatprep.subr.bf16.mxu0 %v3182_v12 }
 0x218   :  { %2621 = vmatpush3.bf16.msra.mxu0 %v3051_v47 }
 0x219   :  { %2622 = vmatprep.subr.bf16.mxu0 %v3182_v12 }
 0x21c   :  { %2623 = vmatpush3.bf16.msra.mxu0 %v3052_v48 }
 0x21d   :  { %2624 = vmatprep.subr.bf16.mxu0 %v3182_v12 }
 0x220   :  { %2625 = vmatpush3.bf16.msra.mxu0 %v3053_v49 }
 0x221   :  { %2626 = vmatprep.subr.bf16.mxu0 %v3182_v12 }
 0x224   :  { %2627 = vmatpush3.bf16.msra.mxu0 %v3054_v50 }
 0x2da   :  { %v2575_v51 = vpop.f32.mrb[4].mxu0  ;;  %v2597_v52 = vpop.f32.mrb[4].mxu1 }
 0x2db   :  { %v2576_v54 = vpop.f32.mrb[5].mxu0  ;;  %v2598_v55 = vpop.f32.mrb[5].mxu1 }
 0x2dc   :  { %v2577_v56 = vadd.f32 %v2576_v54, %v2575_v51  ;;  %v2599_v57 = vadd.f32 %v2598_v55, %v2597_v52  ;;  %v2578_v58 = vpop.f32.mrb[6].mxu0  ;;  %v2600_v59 = vpop.f32.mrb[6].mxu1 }
 0x2dd   :  { %v2579_v60 = vpop.f32.mrb[7].mxu0  ;;  %v2601_v61 = vpop.f32.mrb[7].mxu1 }
 0x2de   :  { %v2110_v62 = vadd.f32 %v2577_v56, %v2517_v53 }
 0x2e0   :  { %v2150_v63 = vadd.f32 %v2599_v57, %v2110_v62 }
 0x2e2   :  { %v2155_v0 = vmax.f32 %v2150_v63, 0.0 }
 0x2e4   :  { %v2156_v1 = vpack.c.bf16 %v2155_v0, %v2155_v0 }
 0x2e6   :  { %2629 = vmatmul.mubr.bf16.vlgmr.msra.gmra.mrb[8].mxu0 %v2156_v1 }
 0x3b9   :  { %v2262_v3 = vpop.f32.mrb[8].mxu0 }
 0x3ba   :  { %v2263_v4 = vadd.f32 %v2550_v2, %v2262_v3  ;;  %v2630_v5 = vpop.f32.mrb[9].mxu0 }
 0x3bb   :  { %v2265_v6 = vpop.f32.mrb[10].mxu0 }
 0x3bc   :  { %2268 = vst [vmem:[#allocation10] sm:$0xff] %v2263_v4  ;;  %v2631_v7 = vpop.f32.mrb[11].mxu0 }
 0x3bd   :  { %3154 = shalt.err (!%p3151_p8)
}
 0x3be   :  { %s3155_s6 = scalar_lea.hbm %s3313_s7, 128 }
 0x3bf   :  { %p3156_p9 = scmp.ne.s32.totalorder %s3313_s7, %s3155_s6  ;;  %p3159_p10 = scmp.lt.u32.totalorder %s3155_s6, %s3313_s7 }
 0x3c1   :  { %p3161_p11 = pnand %p3159_p10, %p3156_p9 }
 0x3c3   :  { %3164 = shalt.err (!%p3161_p11)
}
 0x3c4   :  { %2278 = dma.vmem_to_hbm [thread:$0]  %s2276_s8, 128, %s3313_s7, [#allocation4]  }
 0x3c5   :  { %3171 = dma.done.wait [#allocation4], 128  }
 0x3c6   :  { %3172 = vsyncadd [#allocation4], 4294967168 }
 0x3c7   :  { %2282 = vsyncpa [#allocation3], 1 }
 0x3c8   :  { %2283 = vsyncpa [#allocation6], 1 }
 0x3c9   :  { %2284 = vsyncpa [#allocation9], 1 }
 0x3ca   :  { %2285 = vsyncpa [#allocation4], 1 }

</bundles_post_ra>
